<compile_context>
chip_gen: v5e
topology: v5e:2x2
jax: 0.10.0
libtpu: 0.0.40
codegen_flags: <defaults>
</compile_context>

<pallas_src>
import jax
import jax.numpy as jnp
from jax.experimental import pallas as pl
from jax.experimental.pallas import tpu as pltpu

_SUBLANE = 8                 # f32 sublane granularity
_MAX_BATCH_TILE = 1024       # rows per grid step (amortizes per-step overhead)
_PARALLEL_SPLIT_MIN_B = 512  # ensure >=2 parallel grid steps above this (v7x 2xTC)


def _cdiv(a, b):
    return (a + b - 1) // b


def _round_up(x, mult):
    return ((x + mult - 1) // mult) * mult


def _batch_tiling(B):
    """Pick (batch_tile, grid_len, padded_B) minimizing batch padding."""
    num_tiles = max(1, _cdiv(B, _MAX_BATCH_TILE))
    if B >= _PARALLEL_SPLIT_MIN_B:
        num_tiles = max(num_tiles, 2)   # let v7x's two TensorCores split the grid
    bt = _round_up(_cdiv(B, num_tiles), _SUBLANE)
    grid_len = _cdiv(B, bt)
    return bt, grid_len, grid_len * bt


def _pad_rows(x, rows):
    if x.shape[0] == rows:
        return x
    return jnp.pad(x, ((0, rows - x.shape[0]), (0, 0)))


# ----------------------------- Pallas kernels ------------------------------ #

def _decoder_dgp_kernel(z_ref, w1_ref, b1_ref, w2_ref, b2_ref, out_ref):
    """Fused MLP decoder: out = tanh(z @ W1 + b1) @ W2 + b2."""
    z = z_ref[...].astype(jnp.float32)
    h = jnp.dot(z, w1_ref[...].astype(jnp.float32),
                preferred_element_type=jnp.float32) + b1_ref[...].astype(jnp.float32)
    h = jnp.tanh(h)  # f32 on the EUP (v5e has no bf16 EUP path)
    y = jnp.dot(h, w2_ref[...].astype(jnp.float32),
                preferred_element_type=jnp.float32) + b2_ref[...].astype(jnp.float32)
    out_ref[...] = y.astype(out_ref.dtype)


def _decoder_linear_kernel(z_ref, w_ref, b_ref, out_ref):
    """Plain linear decoder: out = z @ W + b."""
    z = z_ref[...].astype(jnp.float32)
    y = jnp.dot(z, w_ref[...].astype(jnp.float32),
                preferred_element_type=jnp.float32) + b_ref[...].astype(jnp.float32)
    out_ref[...] = y.astype(out_ref.dtype)


# ------------------------------ JAX wrappers ------------------------------- #

def decoder_dgp_forward(z, w1, b1, w2, b2):
    B, m = z.shape
    h = w1.shape[1]
    n = w2.shape[1]
    dtype = z.dtype

    bt, grid_len, B_p = _batch_tiling(B)
    z_p = _pad_rows(z, B_p)   # batch-row padding only; feature dims stay as-is

    out = pl.pallas_call(
        _decoder_dgp_kernel,
        out_shape=jax.ShapeDtypeStruct((B_p, n), dtype),
        grid_spec=pl.GridSpec(
            grid=(grid_len,),
            in_specs=[
                pl.BlockSpec((bt, m), lambda i: (i, 0)),   # z batch tile
                pl.BlockSpec((m, h), lambda i: (0, 0)),    # W1 (VMEM-resident)
                pl.BlockSpec((1, h), lambda i: (0, 0)),    # b1 (VMEM-resident)
                pl.BlockSpec((h, n), lambda i: (0, 0)),    # W2 (VMEM-resident)
                pl.BlockSpec((1, n), lambda i: (0, 0)),    # b2 (VMEM-resident)
            ],
            out_specs=pl.BlockSpec((bt, n), lambda i: (i, 0)),
        ),
        compiler_params=pltpu.CompilerParams(
            dimension_semantics=("parallel",),
        ),
    )(z_p, w1, b1, w2, b2)
    return out if B_p == B else out[:B]


def decoder_linear_forward(z, w, b):
    B, m = z.shape
    n = w.shape[1]
    dtype = z.dtype

    bt, grid_len, B_p = _batch_tiling(B)
    z_p = _pad_rows(z, B_p)

    out = pl.pallas_call(
        _decoder_linear_kernel,
        out_shape=jax.ShapeDtypeStruct((B_p, n), dtype),
        grid_spec=pl.GridSpec(
            grid=(grid_len,),
            in_specs=[
                pl.BlockSpec((bt, m), lambda i: (i, 0)),   # z batch tile
                pl.BlockSpec((m, n), lambda i: (0, 0)),    # W (VMEM-resident)
                pl.BlockSpec((1, n), lambda i: (0, 0)),    # b (VMEM-resident)
            ],
            out_specs=pl.BlockSpec((bt, n), lambda i: (i, 0)),
        ),
        compiler_params=pltpu.CompilerParams(
            dimension_semantics=("parallel",),
        ),
    )(z_p, w, b)
    return out if B_p == B else out[:B]


class MLE:
    """JAX/Pallas port of the PyTorch MLE module (forward returns decoder mean)."""

    def __init__(self, m, n, activation="tanh", fit_s2=True, decoder_dgp=True,
                 hidden=32, key=None, dtype=jnp.float32):
        self.name, self.m, self.n, self.fit_s2 = ("mle", m, n, fit_s2)
        self.activation, self.decoder_dgp = (activation, decoder_dgp)
        self.hidden = hidden
        key = jax.random.PRNGKey(0) if key is None else key
        k1, k2, k3, k4 = jax.random.split(key, 4)
        if decoder_dgp:
            # DecoderDGP: Linear(m, hidden) -> tanh -> Linear(hidden, n)
            s1 = 1.0 / jnp.sqrt(jnp.float32(m))
            s2 = 1.0 / jnp.sqrt(jnp.float32(hidden))
            self.w1 = jax.random.uniform(k1, (m, hidden), dtype, -1.0, 1.0) * s1
            self.b1 = jax.random.uniform(k2, (1, hidden), dtype, -1.0, 1.0) * s1
            self.w2 = jax.random.uniform(k3, (hidden, n), dtype, -1.0, 1.0) * s2
            self.b2 = jax.random.uniform(k4, (1, n), dtype, -1.0, 1.0) * s2
        else:
            # Decoder: single Linear(m, n)
            s = 1.0 / jnp.sqrt(jnp.float32(m))
            self.w = jax.random.uniform(k1, (m, n), dtype, -1.0, 1.0) * s
            self.b = jax.random.uniform(k2, (1, n), dtype, -1.0, 1.0) * s
        if fit_s2:
            # Learnable log-variance; not used in the forward mean (matches PyTorch).
            self.log_s2 = jnp.zeros((1,), dtype)

    def __call__(self, z):
        if self.decoder_dgp:
            return decoder_dgp_forward(z, self.w1, self.b1, self.w2, self.b2)
        return decoder_linear_forward(z, self.w, self.b)

    # pure-JAX reference for validation
    def reference(self, z):
        if self.decoder_dgp:
            h = jnp.tanh(z @ self.w1 + self.b1)
            return h @ self.w2 + self.b2
        return z @ self.w + self.b


# --------------------------------- driver ---------------------------------- #

if __name__ == "__main__":
    key = jax.random.PRNGKey(0)
    kz, kp = jax.random.split(key)

    batch, m, hidden, n = 16, 8, 32, 16
    z = jax.random.normal(kz, (batch, m), jnp.float32)

    # DecoderDGP path (MLP decoder with tanh activation)
    model = MLE(m, n, activation="tanh", fit_s2=True, decoder_dgp=True,
                hidden=hidden, key=kp)
    mean = jax.block_until_ready(model(z))
    ref = model.reference(z)
    assert mean.shape == (batch, n)
    assert jnp.allclose(mean, ref, atol=1e-5, rtol=1e-5), "DGP decoder mismatch"

    # Plain linear Decoder path
    model_lin = MLE(m, n, activation="tanh", fit_s2=False, decoder_dgp=False,
                    key=kp)
    mean_lin = jax.block_until_ready(model_lin(z))
    ref_lin = model_lin.reference(z)
    assert mean_lin.shape == (batch, n)
    assert jnp.allclose(mean_lin, ref_lin, atol=1e-5, rtol=1e-5), "linear decoder mismatch"

    # Non-divisible / larger batch: exercises row padding + >=2 parallel grid steps.
    z_big = jax.random.normal(kz, (1031, m), jnp.float32)
    mean_big = jax.block_until_ready(model(z_big))
    ref_big = model.reference(z_big)
    assert mean_big.shape == (1031, n)
    assert jnp.allclose(mean_big, ref_big, atol=1e-5, rtol=1e-5), "big-batch mismatch"

    print("KERNEL_OK")
</pallas_src>

<mosaic_0001>
module attributes {stable_mosaic.version = 11 : i64} {
  func.func @_decoder_dgp_kernel(%arg0: i32, %arg1: memref<16x8xf32, #tpu.memory_space<vmem>>, %arg2: memref<8x32xf32, #tpu.memory_space<vmem>>, %arg3: memref<1x32xf32, #tpu.memory_space<vmem>>, %arg4: memref<32x16xf32, #tpu.memory_space<vmem>>, %arg5: memref<1x16xf32, #tpu.memory_space<vmem>>, %arg6: memref<16x16xf32, #tpu.memory_space<vmem>>) attributes {dimension_semantics = [#tpu.dimension_semantics<parallel>], iteration_bounds = array<i64: 1>, scalar_prefetch = 0 : i64, scratch_operands = 0 : i64, tpu.core_type = #tpu.core_type<tc>, window_params = [{transform_indices = @transform_0, window_bounds = array<i64: 16, 8>}, {pipeline_mode = #tpu.pipeline_mode<synchronous>, transform_indices = @transform_1, window_bounds = array<i64: 8, 32>}, {pipeline_mode = #tpu.pipeline_mode<synchronous>, transform_indices = @transform_2, window_bounds = array<i64: 1, 32>}, {pipeline_mode = #tpu.pipeline_mode<synchronous>, transform_indices = @transform_3, window_bounds = array<i64: 32, 16>}, {pipeline_mode = #tpu.pipeline_mode<synchronous>, transform_indices = @transform_4, window_bounds = array<i64: 1, 16>}, {transform_indices = @transform_5, window_bounds = array<i64: 16, 16>}]} {
    %c0 = arith.constant 0 : index
    %c0_0 = arith.constant 0 : index
    %0 = vector.load %arg1[%c0, %c0_0] : memref<16x8xf32, #tpu.memory_space<vmem>>, vector<16x8xf32>
    %c0_1 = arith.constant 0 : index
    %c0_2 = arith.constant 0 : index
    %1 = vector.load %arg2[%c0_1, %c0_2] : memref<8x32xf32, #tpu.memory_space<vmem>>, vector<8x32xf32>
    %cst = arith.constant dense<0.000000e+00> : vector<16x32xf32>
    %2 = tpu.matmul %0, %1, %cst {dimension_numbers = #tpu.dot_dimension_numbers<[1], [0], [0], [1], [0, 0, 1, 1], [], []>} : vector<16x8xf32>, vector<8x32xf32>, vector<16x32xf32> -> vector<16x32xf32>
    %c0_3 = arith.constant 0 : index
    %c0_4 = arith.constant 0 : index
    %3 = vector.load %arg3[%c0_3, %c0_4] : memref<1x32xf32, #tpu.memory_space<vmem>>, vector<1x32xf32>
    %4 = vector.broadcast %3 : vector<1x32xf32> to vector<16x32xf32>
    %5 = arith.addf %2, %4 : vector<16x32xf32>
    %6 = math.tanh %5 : vector<16x32xf32>
    %c0_5 = arith.constant 0 : index
    %c0_6 = arith.constant 0 : index
    %7 = vector.load %arg4[%c0_5, %c0_6] : memref<32x16xf32, #tpu.memory_space<vmem>>, vector<32x16xf32>
    %cst_7 = arith.constant dense<0.000000e+00> : vector<16x16xf32>
    %8 = tpu.matmul %6, %7, %cst_7 {dimension_numbers = #tpu.dot_dimension_numbers<[1], [0], [0], [1], [0, 0, 1, 1], [], []>} : vector<16x32xf32>, vector<32x16xf32>, vector<16x16xf32> -> vector<16x16xf32>
    %c0_8 = arith.constant 0 : index
    %c0_9 = arith.constant 0 : index
    %9 = vector.load %arg5[%c0_8, %c0_9] : memref<1x16xf32, #tpu.memory_space<vmem>>, vector<1x16xf32>
    %10 = vector.broadcast %9 : vector<1x16xf32> to vector<16x16xf32>
    %11 = arith.addf %8, %10 : vector<16x16xf32>
    %c0_10 = arith.constant 0 : index
    %c0_11 = arith.constant 0 : index
    %12 = vector.load %arg6[%c0_10, %c0_11] : memref<16x16xf32, #tpu.memory_space<vmem>>, vector<16x16xf32>
    tpu.vector_store %arg6[%c0_10, %c0_11], %11 {strides = array<i32>} : memref<16x16xf32, #tpu.memory_space<vmem>>, vector<16x16xf32>,
    return
  }
  func.func @transform_0(%arg0: i32) -> (i32, i32) {
    %c0_i32 = arith.constant 0 : i32
    %c0_i32_0 = arith.constant 0 : i32
    return %arg0, %c0_i32 : i32, i32
  }
  func.func @transform_1(%arg0: i32) -> (i32, i32) {
    %c0_i32 = arith.constant 0 : i32
    %c0_i32_0 = arith.constant 0 : i32
    %c0_i32_1 = arith.constant 0 : i32
    return %c0_i32, %c0_i32_0 : i32, i32
  }
  func.func @transform_2(%arg0: i32) -> (i32, i32) {
    %c0_i32 = arith.constant 0 : i32
    %c0_i32_0 = arith.constant 0 : i32
    %c0_i32_1 = arith.constant 0 : i32
    return %c0_i32, %c0_i32_0 : i32, i32
  }
  func.func @transform_3(%arg0: i32) -> (i32, i32) {
    %c0_i32 = arith.constant 0 : i32
    %c0_i32_0 = arith.constant 0 : i32
    %c0_i32_1 = arith.constant 0 : i32
    return %c0_i32, %c0_i32_0 : i32, i32
  }
  func.func @transform_4(%arg0: i32) -> (i32, i32) {
    %c0_i32 = arith.constant 0 : i32
    %c0_i32_0 = arith.constant 0 : i32
    %c0_i32_1 = arith.constant 0 : i32
    return %c0_i32, %c0_i32_0 : i32, i32
  }
  func.func @transform_5(%arg0: i32) -> (i32, i32) {
    %c0_i32 = arith.constant 0 : i32
    %c0_i32_0 = arith.constant 0 : i32
    return %arg0, %c0_i32 : i32, i32
  }
}

</mosaic_0001>

<bundles_post_ra>
// kernel: tpu_custom_call.1
= control target key start
LH: loop header
LB: loop body
LE: loop exit
PB: predicated region body
PF: predicated region fallthrough
CT: control target
= control target key end

     0   :  { %vm28_vm0 = vcmask 64512   ;;  %s226_s0 = inlined_call_operand.vmem [shape: f32[16,8], index: 0, kind: input, shape index: {}]   ;;  %s227_s1 = inlined_call_operand.vmem [shape: f32[8,32], index: 1, kind: input, shape index: {}]   ;;  %s228_s2 = inlined_call_operand.vmem [shape: f32[1,32], index: 2, kind: input, shape index: {}]   ;;  %s229_s3 = inlined_call_operand.vmem [shape: f32[32,16], index: 3, kind: input, shape index: {}]   ;;  %s230_s4 = inlined_call_operand.vmem [shape: f32[1,16], index: 4, kind: input, shape index: {}]   ;;  %s231_s5 = inlined_call_operand.hbm [shape: f32[16,16], index: 5, kind: output, shape index: {}]  }
   0x1   :  { %v23_v0 = vld [vmem:[%s227_s1] sm:$0xff]  ;;  %v22_v1 = vld [vmem:[%s226_s0 + $0x8] sm:$0xff] }
   0x2   :  { %v21_v2 = vld [vmem:[%s226_s0] sm:$0xff]  ;;  %123 = vmatpush.msra.mxu3 %v23_v0  ;;  %50 = vmatpush.msra.mxu0 %v23_v0 }
   0x3   :  { %120 = vmatmul.msk.f32.vlgmr.msra.gmra.mxu3 %vm28_vm0, %v22_v1  ;;  %119 = vmatmul.msk.f32.vlgmr.msra.gmra.mxu0 %vm28_vm0, %v21_v2 }
   0x4   :  { %10 = vsyncpa [#allocation3], 0  ;;  %v63_v3 = vld [vmem:[%s229_s3 + $0x18] sm:$0xff]  ;;  %v62_v4 = vld [vmem:[%s229_s3 + $0x10] sm:$0xff]  ;;  %vm68_vm1 = vcmask 261120   ;;  %vm98_vm2 = vcmask 130048  }
   0x5   :  { %124 = vmatpush.msra.mxu2 %v63_v3  ;;  %87 = vmatpush.msra.mxu1 %v63_v3  ;;  %v61_v5 = vld [vmem:[%s229_s3 + $0x8] sm:$0xff]  ;;  %v60_v6 = vld [vmem:[%s229_s3] sm:$0xff]  ;;  %s107_s11 = sshll.u32 %s231_s5, 4  ;;  %s164_s12 = smov 128   ;;  %s108_s11 = int_to_ptr.hbm [resolvable:$true] %s107_s11 }
   0x6   :  { %v131_v7 = vld [vmem:[%s228_s2] ss:$0 sm:$0xff]  ;;  %s163_s2 = smov [#allocation2]   ;;  %s165_s13 = smov 8  }
   0x7   :  { %125 = vmatpush.msra.mxu2 %v62_v4  ;;  %88 = vmatpush.msra.mxu1 %v62_v4  ;;  %v132_v14 = vld [vmem:[%s230_s4] ss:$0 sm:$0xff]  ;;  %s105_s8 = sshll.u32 %s163_s2, 4  ;;  %s106_s8 = int_to_ptr.vmem [resolvable:$true] %s105_s8 }
   0x9   :  { %126 = vmatpush.msra.mxu2 %v61_v5  ;;  %89 = vmatpush.msra.mxu1 %v61_v5 }
   0xb   :  { %127 = vmatpush.msra.mxu2 %v60_v6  ;;  %90 = vmatpush.msra.mxu1 %v60_v6 }
  0x80   :  { %v52_v8 = vpop.f32.mrf.mxu0 }
  0x81   :  { %v53_v9 = vadd.f32 %v131_v7, %v52_v8 }
  0x83   :  { %133 = vtanh.f32 %v53_v9 }
  0x86   :  { %v55_v10 = vpop.f32.mrf.mxu3 }
  0x87   :  { %v56_v11 = vadd.f32 %v131_v7, %v55_v10 }
  0x89   :  { %v134_v12 = vpop.eup %133  ;;  %135 = vtanh.f32 %v56_v11 }
  0x8a   :  { %121 = vmatmul.msk.f32.vlgmr.msra.gmra.mxu1 %vm68_vm1, %v134_v12 }
  0x8f   :  { %v136_v13 = vpop.eup %135 }
  0x90   :  { %122 = vmatmul.msk.f32.vlgmr.msra.gmra.mxu2 %vm68_vm1, %v136_v13 }
 0x107   :  { %v92_v15 = vpop.f32.mrf.mxu1 }
 0x108   :  { %v93_v16 = vadd.f32 %v132_v14, %v92_v15 }
 0x10a   :  { %99 = vst.msk [vmem:[#allocation2] sm:$0xff] %vm98_vm2, %v93_v16 }
 0x113   :  { %v95_v17 = vpop.f32.mrf.mxu2 }
 0x114   :  { %v96_v18 = vadd.f32 %v132_v14, %v95_v17 }
 0x116   :  { %100 = vst.msk [vmem:[#allocation2 + $0x8] sm:$0xff] %vm98_vm2, %v96_v18 }
 0x117   :  { %113 = dma.vmem_to_hbm [thread:$0]  %s106_s8, 256, %s108_s11, [#allocation3], %s164_s12, %s164_s12, %s165_s13  }
 0x118   :  { %161 = dma.done.wait [#allocation3], 256  }
 0x119   :  { %162 = vsyncadd [#allocation3], 4294967040 }
 0x11a   :  { %118 = vsyncpa [#allocation3], 1 }

</bundles_post_ra>
